<compile_context>
chip_gen: v7x
topology: tpu7x:2x2x1
jax: 0.10.0
libtpu: 0.0.40
codegen_flags: <defaults>
</compile_context>

<pallas_src>
import functools

import jax
import jax.numpy as jnp
from jax import lax
from jax.experimental import pallas as pl
from jax.experimental.pallas import tpu as pltpu


def _round_up(v, m):
    return (v + m - 1) // m * m


def _full_conn_kernel(x_ref, w1_ref, b1_ref, w2_ref, b2_ref, o_ref, *, chunk):
    """One row-block: (chunked) x @ w1 + b1 -> ReLU -> @ w2 + b2."""
    # Weights / biases are tiny and VMEM-resident across the whole grid
    # (index_map -> (0, 0)); load them once outside the chunk loop.
    w1 = w1_ref[...]
    w2 = w2_ref[...]
    b1 = b1_ref[...]
    b2 = b2_ref[...]

    n_chunks = x_ref.shape[0] // chunk          # static (tile % chunk == 0)

    def body(c, carry):
        r = c * chunk
        if chunk % 8 == 0:                       # static hint: sublane aligned
            r = pl.multiple_of(r, 8)
        # Cast to the MXU compute dtype in-vreg (no extra HBM pass for bf16).
        x = x_ref[pl.ds(r, chunk), :].astype(w1.dtype)
        h = jnp.dot(x, w1, preferred_element_type=jnp.float32)
        # Bias + ReLU stay in fp32 vregs (v5e has no bf16 VPU path);
        # drop1 / drop2 are identity in eval mode.
        h = jnp.maximum(h + b1, 0.0)
        o = jnp.dot(h.astype(w2.dtype), w2,
                    preferred_element_type=jnp.float32) + b2
        o_ref[pl.ds(r, chunk), :] = o.astype(o_ref.dtype)
        return carry

    lax.fori_loop(0, n_chunks, body, 0, unroll=True)


def fold_full_conn_params(params, eps=1e-5, compute_dtype=jnp.float32):
    """Fold eval-mode BatchNorm affines into the Linear weights.

    Call ONCE per parameter update (not per forward) and reuse the result:
        w1' = diag(s1) @ W1^T    bias1 = b1 @ W1^T
        w2' = diag(s2) @ W2^T    bias2 = b2 @ W2^T
    compute_dtype=jnp.bfloat16 is recommended on v6e/v7x (f32 accumulation is
    kept inside the kernel); fp32 default gives a bit-accurate reference path.
    """
    s1 = params["bn1_gamma"] / jnp.sqrt(params["bn1_var"] + eps)      # [IN]
    b1 = params["bn1_beta"] - params["bn1_mean"] * s1                 # [IN]
    s2 = params["bn2_gamma"] / jnp.sqrt(params["bn2_var"] + eps)      # [H0]
    b2 = params["bn2_beta"] - params["bn2_mean"] * s2                 # [H0]

    w1_t = params["lin1_w"].T                                         # [IN, H0]
    w2_t = params["lin2_w"].T                                         # [H0, OUT]
    w1 = (s1[:, None] * w1_t).astype(compute_dtype)                   # [IN, H0]
    w2 = (s2[:, None] * w2_t).astype(compute_dtype)                   # [H0, OUT]
    bias1 = (b1 @ w1_t).reshape(1, -1).astype(jnp.float32)            # [1, H0]
    bias2 = (b2 @ w2_t).reshape(1, -1).astype(jnp.float32)            # [1, OUT]
    return w1, bias1, w2, bias2


def full_conn_forward(x, folded, *, tile_n=4096, out_dtype=jnp.float32,
                      vmem_budget_bytes=12 * 1024 * 1024):
    """x: [N, IN].  folded: output of fold_full_conn_params (hoisted per-update).

    tile_n: target rows per grid step (2048-8192 recommended); capped so the
    double-buffered x/out blocks + the [tile, H0] intermediate stay inside a
    ~12 MiB VMEM budget (safe under v5e's 16 MiB default scoped limit).
    out_dtype: set to jnp.bfloat16 if the consumer accepts it (halves the
    output HBM stream); fp32 default for bit-accurate testing.
    """
    w1, bias1, w2, bias2 = folded
    n, f_in = x.shape
    h0 = w1.shape[1]
    f_out = w2.shape[1]

    x_bytes = jnp.dtype(x.dtype).itemsize
    o_bytes = jnp.dtype(out_dtype).itemsize
    w_bytes = jnp.dtype(w1.dtype).itemsize

    # --- row-tile selection --------------------------------------------------
    # Per-row VMEM: double-buffered x + out blocks plus the [tile, H0] f32
    # intermediate; weights are a small resident constant.
    weight_vmem = 2 * (f_in * h0 + h0 * f_out) * w_bytes + 2 * (h0 + f_out) * 4
    per_row = 2 * f_in * x_bytes + 2 * f_out * o_bytes + h0 * 4
    max_rows = max(512, (vmem_budget_bytes - weight_vmem) // per_row)
    tile_big = max(512, (min(tile_n, max_rows) // 512) * 512)  # multiple of 512

    if n > tile_big:
        tile = tile_big                 # big tiles, 512-row chunks in-kernel
    elif n >= 1024:
        # At least 2 grid steps so v7x's two TensorCores both get rows.
        tile = _round_up(pl.cdiv(n, 2), 8)
    else:
        tile = n                        # block == full row dim (always valid)

    # In-kernel sub-chunking only for the large multiple-of-512 tiles.
    chunk = 512 if (tile > 512 and tile % 512 == 0) else tile
    grid = (pl.cdiv(n, tile),)          # tail block handled by Pallas masking

    cost = pl.CostEstimate(
        flops=2 * n * (f_in * h0 + h0 * f_out),
        transcendentals=0,
        bytes_accessed=(n * f_in * x_bytes + n * f_out * o_bytes
                        + (f_in * h0 + h0 * f_out) * w_bytes
                        + (h0 + f_out) * 4),
    )

    out = pl.pallas_call(
        functools.partial(_full_conn_kernel, chunk=chunk),
        out_shape=jax.ShapeDtypeStruct((n, f_out), out_dtype),
        grid=grid,
        in_specs=[
            pl.BlockSpec((tile, f_in), lambda i: (i, 0)),   # x rows: tiled
            pl.BlockSpec((f_in, h0),   lambda i: (0, 0)),   # w1: VMEM-resident
            pl.BlockSpec((1, h0),      lambda i: (0, 0)),   # bias1: resident
            pl.BlockSpec((h0, f_out),  lambda i: (0, 0)),   # w2: resident
            pl.BlockSpec((1, f_out),   lambda i: (0, 0)),   # bias2: resident
        ],
        out_specs=pl.BlockSpec((tile, f_out), lambda i: (i, 0)),
        compiler_params=pltpu.CompilerParams(
            dimension_semantics=("parallel",)),             # v7x: 2 TCs split rows
        cost_estimate=cost,
    )(x, w1, bias1, w2, bias2)

    return out


def make_params(key, f_in, h0, f_out):
    ks = jax.random.split(key, 10)
    return {
        # BN1 (affine + running stats) — deterministic, non-trivial values
        "bn1_gamma": jax.random.uniform(ks[0], (f_in,), jnp.float32, 0.5, 1.5),
        "bn1_beta":  jax.random.normal(ks[1], (f_in,), jnp.float32) * 0.1,
        "bn1_mean":  jax.random.normal(ks[2], (f_in,), jnp.float32) * 0.1,
        "bn1_var":   jax.random.uniform(ks[3], (f_in,), jnp.float32, 0.5, 1.5),
        # Linear1: [H0, IN]
        "lin1_w": jax.random.normal(ks[4], (h0, f_in), jnp.float32)
                  * (1.0 / jnp.sqrt(f_in)),
        # BN2
        "bn2_gamma": jax.random.uniform(ks[5], (h0,), jnp.float32, 0.5, 1.5),
        "bn2_beta":  jax.random.normal(ks[6], (h0,), jnp.float32) * 0.1,
        "bn2_mean":  jax.random.normal(ks[7], (h0,), jnp.float32) * 0.1,
        "bn2_var":   jax.random.uniform(ks[8], (h0,), jnp.float32, 0.5, 1.5),
        # Linear2: [OUT, H0]
        "lin2_w": jax.random.normal(ks[9], (f_out, h0), jnp.float32)
                  * (1.0 / jnp.sqrt(h0)),
    }


def reference_forward(x, p, eps=1e-5):
    """Pure-JAX reference of the eval-mode PyTorch forward."""
    h = (x - p["bn1_mean"]) / jnp.sqrt(p["bn1_var"] + eps) * p["bn1_gamma"] + p["bn1_beta"]
    h = h @ p["lin1_w"].T
    h = jnp.maximum(h, 0.0)
    h = (h - p["bn2_mean"]) / jnp.sqrt(p["bn2_var"] + eps) * p["bn2_gamma"] + p["bn2_beta"]
    return h @ p["lin2_w"].T


if __name__ == "__main__":
    F_IN, H0, F_OUT = 32, 64, 16        # hyper_params: in=32, H=[64], out=16
    key = jax.random.PRNGKey(0)
    kx, kp, kb, kc = jax.random.split(key, 4)
    params = make_params(kp, F_IN, H0, F_OUT)

    # Fold BN into the weights once (per parameter update), not per forward.
    folded = fold_full_conn_params(params)

    # 1) small batch: single grid step
    x = jax.random.normal(kx, (8, F_IN), jnp.float32)
    out = jax.block_until_ready(full_conn_forward(x, folded))
    ref = reference_forward(x, params)
    assert out.shape == (8, F_OUT)
    assert jnp.allclose(out, ref, atol=1e-4, rtol=1e-4), "small-batch mismatch"

    # 2) medium batch: >=2 grid steps (v7x megacore) + masked tail block
    xb = jax.random.normal(kb, (1030, F_IN), jnp.float32)
    out_b = jax.block_until_ready(full_conn_forward(xb, folded))
    ref_b = reference_forward(xb, params)
    assert out_b.shape == (1030, F_OUT)
    assert jnp.allclose(out_b, ref_b, atol=1e-4, rtol=1e-4), "tiled path mismatch"

    # 3) larger batch with a forced 2048-row tile: exercises the in-kernel
    #    512-row chunking and the masked tail of the last big block.
    xc = jax.random.normal(kc, (4112, F_IN), jnp.float32)
    out_c = jax.block_until_ready(full_conn_forward(xc, folded, tile_n=2048))
    ref_c = reference_forward(xc, params)
    assert out_c.shape == (4112, F_OUT)
    assert jnp.allclose(out_c, ref_c, atol=1e-4, rtol=1e-4), "chunked path mismatch"

    print("KERNEL_OK")
</pallas_src>

<mosaic_0001>
module attributes {stable_mosaic.version = 11 : i64} {
  func.func @_full_conn_kernel(%arg0: i32, %arg1: memref<8x32xf32, #tpu.memory_space<vmem>>, %arg2: memref<32x64xf32, #tpu.memory_space<vmem>>, %arg3: memref<1x64xf32, #tpu.memory_space<vmem>>, %arg4: memref<64x16xf32, #tpu.memory_space<vmem>>, %arg5: memref<1x16xf32, #tpu.memory_space<vmem>>, %arg6: memref<8x16xf32, #tpu.memory_space<vmem>>) attributes {dimension_semantics = [#tpu.dimension_semantics<parallel>], iteration_bounds = array<i64: 1>, scalar_prefetch = 0 : i64, scratch_operands = 0 : i64, tpu.core_type = #tpu.core_type<tc>, window_params = [{transform_indices = @transform_0, window_bounds = array<i64: 8, 32>}, {pipeline_mode = #tpu.pipeline_mode<synchronous>, transform_indices = @transform_1, window_bounds = array<i64: 32, 64>}, {pipeline_mode = #tpu.pipeline_mode<synchronous>, transform_indices = @transform_2, window_bounds = array<i64: 1, 64>}, {pipeline_mode = #tpu.pipeline_mode<synchronous>, transform_indices = @transform_3, window_bounds = array<i64: 64, 16>}, {pipeline_mode = #tpu.pipeline_mode<synchronous>, transform_indices = @transform_4, window_bounds = array<i64: 1, 16>}, {transform_indices = @transform_5, window_bounds = array<i64: 8, 16>}]} {
    %c0 = arith.constant 0 : index
    %c0_0 = arith.constant 0 : index
    %0 = vector.load %arg2[%c0, %c0_0] : memref<32x64xf32, #tpu.memory_space<vmem>>, vector<32x64xf32>
    %c0_1 = arith.constant 0 : index
    %c0_2 = arith.constant 0 : index
    %1 = vector.load %arg4[%c0_1, %c0_2] : memref<64x16xf32, #tpu.memory_space<vmem>>, vector<64x16xf32>
    %c0_3 = arith.constant 0 : index
    %c0_4 = arith.constant 0 : index
    %2 = vector.load %arg3[%c0_3, %c0_4] : memref<1x64xf32, #tpu.memory_space<vmem>>, vector<1x64xf32>
    %c0_5 = arith.constant 0 : index
    %c0_6 = arith.constant 0 : index
    %3 = vector.load %arg5[%c0_5, %c0_6] : memref<1x16xf32, #tpu.memory_space<vmem>>, vector<1x16xf32>
    %c0_i32 = arith.constant 0 : i32
    %c8_i32 = arith.constant 8 : i32
    %4 = arith.muli %c0_i32, %c8_i32 : i32
    %5 = tpu.assume_multiple %4, 8 : i32
    %6 = arith.index_cast %5 : i32 to index
    %c0_7 = arith.constant 0 : index
    %7 = vector.load %arg1[%6, %c0_7] : memref<8x32xf32, #tpu.memory_space<vmem>>, vector<8x32xf32>
    %cst = arith.constant dense<0.000000e+00> : vector<8x64xf32>
    %8 = tpu.matmul %7, %0, %cst {dimension_numbers = #tpu.dot_dimension_numbers<[1], [0], [0], [1], [0, 0, 1, 1], [], []>} : vector<8x32xf32>, vector<32x64xf32>, vector<8x64xf32> -> vector<8x64xf32>
    %9 = vector.broadcast %2 : vector<1x64xf32> to vector<8x64xf32>
    %10 = arith.addf %8, %9 : vector<8x64xf32>
    %cst_8 = arith.constant 0.000000e+00 : f32
    %11 = vector.broadcast %cst_8 : f32 to vector<8x64xf32>
    %12 = arith.maximumf %10, %11 : vector<8x64xf32>
    %cst_9 = arith.constant dense<0.000000e+00> : vector<8x16xf32>
    %13 = tpu.matmul %12, %1, %cst_9 {dimension_numbers = #tpu.dot_dimension_numbers<[1], [0], [0], [1], [0, 0, 1, 1], [], []>} : vector<8x64xf32>, vector<64x16xf32>, vector<8x16xf32> -> vector<8x16xf32>
    %14 = vector.broadcast %3 : vector<1x16xf32> to vector<8x16xf32>
    %15 = arith.addf %13, %14 : vector<8x16xf32>
    %16 = arith.index_cast %5 : i32 to index
    %c0_10 = arith.constant 0 : index
    %17 = vector.load %arg6[%16, %c0_10] : memref<8x16xf32, #tpu.memory_space<vmem>>, vector<8x16xf32>
    tpu.vector_store %arg6[%16, %c0_10], %15 {strides = array<i32>} : memref<8x16xf32, #tpu.memory_space<vmem>>, vector<8x16xf32>,
    %c1_i32 = arith.constant 1 : i32
    return
  }
  func.func @transform_0(%arg0: i32) -> (i32, i32) {
    %c0_i32 = arith.constant 0 : i32
    %c0_i32_0 = arith.constant 0 : i32
    return %arg0, %c0_i32 : i32, i32
  }
  func.func @transform_1(%arg0: i32) -> (i32, i32) {
    %c0_i32 = arith.constant 0 : i32
    %c0_i32_0 = arith.constant 0 : i32
    %c0_i32_1 = arith.constant 0 : i32
    return %c0_i32, %c0_i32_0 : i32, i32
  }
  func.func @transform_2(%arg0: i32) -> (i32, i32) {
    %c0_i32 = arith.constant 0 : i32
    %c0_i32_0 = arith.constant 0 : i32
    %c0_i32_1 = arith.constant 0 : i32
    return %c0_i32, %c0_i32_0 : i32, i32
  }
  func.func @transform_3(%arg0: i32) -> (i32, i32) {
    %c0_i32 = arith.constant 0 : i32
    %c0_i32_0 = arith.constant 0 : i32
    %c0_i32_1 = arith.constant 0 : i32
    return %c0_i32, %c0_i32_0 : i32, i32
  }
  func.func @transform_4(%arg0: i32) -> (i32, i32) {
    %c0_i32 = arith.constant 0 : i32
    %c0_i32_0 = arith.constant 0 : i32
    %c0_i32_1 = arith.constant 0 : i32
    return %c0_i32, %c0_i32_0 : i32, i32
  }
  func.func @transform_5(%arg0: i32) -> (i32, i32) {
    %c0_i32 = arith.constant 0 : i32
    %c0_i32_0 = arith.constant 0 : i32
    return %arg0, %c0_i32 : i32, i32
  }
}

</mosaic_0001>

<bundles_post_ra>
// kernel: tpu_custom_call.1
= control target key start
LH: loop header
LB: loop body
LE: loop exit
PB: predicated region body
PF: predicated region fallthrough
CT: control target
= control target key end

     0   :  { %v307_v3 = vmov 0.0|0.0   ;;  %vm308_vm0 = vmmov 0   ;;  %v309_v6 = vmov 0.0   ;;  %s398_s0 = inlined_call_operand.vmem [shape: f32[8,32], index: 0, kind: input, shape index: {}]   ;;  %s399_s1 = inlined_call_operand.vmem [shape: f32[32,64], index: 1, kind: input, shape index: {}]   ;;  %s400_s2 = inlined_call_operand.vmem [shape: f32[1,64], index: 2, kind: input, shape index: {}]   ;;  %s401_s3 = inlined_call_operand.vmem [shape: f32[64,16], index: 3, kind: input, shape index: {}]   ;;  %s402_s4 = inlined_call_operand.vmem [shape: f32[1,16], index: 4, kind: input, shape index: {}]   ;;  %s403_s5 = inlined_call_operand.hbm [shape: f32[8,16], index: 5, kind: output, shape index: {}]  }
   0x1   :  { %v21_v0 = vld [vmem:[%s399_s1] sm:$0xff]  ;;  %v22_v1 = vld [vmem:[%s399_s1 + $0x8] sm:$0xff]  ;;  %v23_v2 = vld [vmem:[%s399_s1 + $0x10] sm:$0xff]  ;;  %261 = vmatprep.subr.bf16.mxu0 %v307_v3  ;;  %239 = vmatprep.mubr.msk.f32.mxu0 %vm308_vm0, %v309_v6 }
   0x2   :  { %v262_v4 = vpack.c.bf16 %v22_v1, %v21_v0  ;;  %v24_v5 = vld [vmem:[%s399_s1 + $0x18] sm:$0xff]  ;;  %v25_v7 = vld [vmem:[%s401_s3] sm:$0xff]  ;;  %267 = vmatprep.subr.bf16.mxu1 %v307_v3  ;;  %v26_v8 = vld [vmem:[%s401_s3 + $0x8] sm:$0xff]  ;;  %258 = vmatprep.mubr.msk.f32.mxu1 %vm308_vm0, %v309_v6 }
   0x3   :  { %v27_v9 = vld [vmem:[%s401_s3 + $0x10] sm:$0xff]  ;;  %v28_v10 = vld [vmem:[%s401_s3 + $0x18] sm:$0xff]  ;;  %v265_v11 = vpack.c.bf16 %v24_v5, %v23_v2  ;;  %v268_v12 = vpack.c.bf16 %v26_v8, %v25_v7 }
   0x4   :  { %263 = vmatpush3.bf16.msra.mxu0 %v262_v4 }
   0x5   :  { %264 = vmatprep.subr.bf16.mxu0 %v307_v3 }
   0x6   :  { %10 = vsyncpa [#allocation3], 0  ;;  %269 = vmatpush3.bf16.msra.mxu1 %v268_v12  ;;  %v271_v13 = vpack.c.bf16 %v28_v10, %v27_v9  ;;  %v29_v14 = vld [vmem:[%s401_s3 + $0x20] sm:$0xff]  ;;  %v30_v15 = vld [vmem:[%s401_s3 + $0x28] sm:$0xff]  ;;  %vm42_vm1 = vcmask 261120   ;;  %vm123_vm2 = vcmask 523264  }
   0x7   :  { %270 = vmatprep.subr.bf16.mxu1 %v307_v3  ;;  %v35_v16 = vld [vmem:[%s398_s0] sm:$0xff]  ;;  %v274_v17 = vpack.c.bf16 %v30_v15, %v29_v14  ;;  %v31_v18 = vld [vmem:[%s401_s3 + $0x30] sm:$0xff]  ;;  %v32_v19 = vld [vmem:[%s401_s3 + $0x38] sm:$0xff]  ;;  %s310_s21 = smov [#allocation2]   ;;  %vm197_vm3 = vcmask 130048  }
   0x8   :  { %266 = vmatpush3.bf16.msra.mxu0 %v265_v11  ;;  %v277_v20 = vpack.c.bf16 %v32_v19, %v31_v18  ;;  %v213_v21 = vld [vmem:[%s400_s2] ss:$0 sm:$0xff]  ;;  %s205_s22 = sshll.u32 %s310_s21, 4  ;;  %s206_s22 = int_to_ptr.vmem [resolvable:$true] %s205_s22 }
   0x9   :  { %v215_v26 = vld [vmem:[%s402_s4] ss:$0 sm:$0xff]  ;;  %s283_s3 = scalar_lea.vmem %s206_s22, 128  ;;  %p288_p1 = scmp.lt.s32.totalorder %s206_s22, %s206_s22 }
   0xa   :  { %272 = vmatpush3.bf16.msra.mxu1 %v271_v13  ;;  %p284_p0 = scmp.ne.s32.totalorder %s206_s22, %s283_s3  ;;  %p289_p2 = scmp.lt.s32.totalorder %s283_s3, %s283_s3 }
   0xb   :  { %240 = vmatmul.mubr.msk.f32.vlgmr.msra.gmra.mrb[0].mxu0 %vm42_vm1, %v35_v16  ;;  %273 = vmatprep.subr.bf16.mxu1 %v307_v3 }
   0xc   :  { %p290_p3 = por %p289_p2, %p288_p1 }
   0xe   :  { %275 = vmatpush3.bf16.msra.mxu1 %v274_v17  ;;  %p291_p4 = pnand %p290_p3, %p284_p0 }
   0xf   :  { %276 = vmatprep.subr.bf16.mxu1 %v307_v3 }
  0x12   :  { %278 = vmatpush3.bf16.msra.mxu1 %v277_v20 }
  0xde   :  { %v112_v22 = vpop.f32.mrb[0].mxu0 }
  0xdf   :  { %v113_v23 = vadd.f32 %v213_v21, %v112_v22  ;;  %v241_v24 = vpop.f32.mrb[1].mxu0 }
  0xe1   :  { %v116_v25 = vmax.f32 %v113_v23, 0.0 }
  0xe3   :  { %259 = vmatmul.mubr.msk.f32.vlgmr.msra.gmra.mrb[0].mxu1 %vm123_vm2, %v116_v25 }
 0x1b6   :  { %v193_v27 = vpop.f32.mrb[0].mxu1 }
 0x1b7   :  { %v194_v28 = vadd.f32 %v215_v26, %v193_v27  ;;  %v260_v29 = vpop.f32.mrb[1].mxu1 }
 0x1b9   :  { %198 = vst.msk [vmem:[#allocation2] sm:$0xff] %vm197_vm3, %v194_v28 }
 0x1ba   :  { %294 = shalt.err (!%p291_p4)
}
 0x1bb   :  { %s295_s24 = scalar_lea.hbm %s403_s5, 128 }
 0x1bc   :  { %p296_p5 = scmp.ne.s32.totalorder %s403_s5, %s295_s24  ;;  %p299_p6 = scmp.lt.u32.totalorder %s295_s24, %s403_s5 }
 0x1be   :  { %p301_p7 = pnand %p299_p6, %p296_p5 }
 0x1c0   :  { %304 = shalt.err (!%p301_p7)
}
 0x1c1   :  { %208 = dma.vmem_to_hbm [thread:$0]  %s206_s22, 128, %s403_s5, [#allocation3]  }
 0x1c2   :  { %305 = dma.done.wait [#allocation3], 128  }
 0x1c3   :  { %306 = vsyncadd [#allocation3], 4294967168 }
 0x1c4   :  { %212 = vsyncpa [#allocation3], 1 }

</bundles_post_ra>
